<compile_context>
chip_gen: v7x
topology: tpu7x:2x2x1
jax: 0.10.0
libtpu: 0.0.40
codegen_flags: <defaults>
</compile_context>

<pallas_src>
import jax
import jax.numpy as jnp
from jax.experimental import pallas as pl
from jax.experimental.pallas import tpu as pltpu


def _round_up(n, m):
    return ((n + m - 1) // m) * m


def dae_kernel(x_ref, w_enc_ref, b_enc_ref, w_dec_ref, b_dec_ref, o_ref):
    # x_ref:     (TBg, pack*motion_dim)   packed batch rows, lane-dense
    # w_enc_ref: (pack*motion_dim, pack*latent_dim)  block-diag W_enc^T
    # b_enc_ref: (1, pack*latent_dim)
    # w_dec_ref: (pack*latent_dim, pack*motion_dim)  block-diag W_dec^T
    # b_dec_ref: (1, pack*motion_dim)
    # o_ref:     (TBg, pack*motion_dim)
    h = jnp.tanh(
        jnp.dot(x_ref[...], w_enc_ref[...], preferred_element_type=jnp.float32)
        + b_enc_ref[...]
    )
    y = (
        jnp.dot(h, w_dec_ref[...], preferred_element_type=jnp.float32)
        + b_dec_ref[...]
    )
    o_ref[...] = y.astype(o_ref.dtype)


def dae_forward(x, w_enc, b_enc, w_dec, b_dec, *,
                tbg_cap=8192, vmem_limit_bytes=48 * 1024 * 1024):
    """x: (B, motion_dim, 1) float32.  Returns (B, motion_dim, 1) float32.

    Weights are in PyTorch nn.Linear layout:
      w_enc: (latent_dim, motion_dim), b_enc: (latent_dim,)
      w_dec: (motion_dim, latent_dim), b_dec: (motion_dim,)
    """
    # torch.squeeze(x) would drop *all* size-1 dims; we squeeze only axis 2 so
    # the wrapper is shape-safe for B == 1 (documented divergence).
    x2d = jnp.squeeze(x, axis=2)                     # (B, motion_dim)
    B, motion_dim = x2d.shape
    latent_dim = w_enc.shape[0]

    # Lane-packing factor: pack consecutive batch rows so the minor dim of the
    # streamed arrays is a full 128 lanes (dense DMA + unmasked stores).
    if motion_dim <= 128 and 128 % motion_dim == 0:
        pack = 128 // motion_dim
    else:
        pack = 1                                      # fallback: natural layout

    # Tiny pad so B is a multiple of pack*8 (<= pack*8-1 rows); never pad to TB.
    B_pad = _round_up(B, pack * 8)
    if B_pad != B:
        x2d = jnp.pad(x2d, ((0, B_pad - B), (0, 0)))
    Bg = B_pad // pack
    lanes_in = pack * motion_dim
    lanes_mid = pack * latent_dim

    # Row-major merge of (pack, motion_dim) -> same bytes, free bitcast reshape.
    x_packed = x2d.reshape(Bg, lanes_in)

    # Block-diagonal weights (tiny, built once per call; stay VMEM-resident).
    eye = jnp.eye(pack, dtype=w_enc.dtype)
    w_enc_bd = jnp.kron(eye, w_enc.T)                 # (lanes_in, lanes_mid)
    w_dec_bd = jnp.kron(eye, w_dec.T)                 # (lanes_mid, lanes_in)
    b_enc_t = jnp.tile(b_enc, pack).reshape(1, lanes_mid)
    b_dec_t = jnp.tile(b_dec, pack).reshape(1, lanes_in)

    # Packed-row tile: Bg is a multiple of 8, cap amortizes per-step overhead.
    TBg = min(tbg_cap, Bg)
    grid = (pl.cdiv(Bg, TBg),)

    # Advisory cost hint: real HBM traffic is one pass over x + one over y
    # plus the (tiny) weights; flops are the hardware (block-diagonal) flops.
    cost = pl.CostEstimate(
        flops=4 * pack * B_pad * motion_dim * latent_dim,
        transcendentals=B_pad * latent_dim,
        bytes_accessed=4 * (2 * B_pad * motion_dim
                            + 2 * lanes_in * lanes_mid
                            + lanes_in + lanes_mid),
    )

    out_packed = pl.pallas_call(
        dae_kernel,
        out_shape=jax.ShapeDtypeStruct((Bg, lanes_in), jnp.float32),
        grid=grid,
        in_specs=[
            # Activation tile streams across the batch grid (double-buffered).
            pl.BlockSpec((TBg, lanes_in), lambda i: (i, 0)),
            # Weights / biases: same block every step -> stay VMEM-resident.
            pl.BlockSpec((lanes_in, lanes_mid), lambda i: (0, 0)),
            pl.BlockSpec((1, lanes_mid), lambda i: (0, 0)),
            pl.BlockSpec((lanes_mid, lanes_in), lambda i: (0, 0)),
            pl.BlockSpec((1, lanes_in), lambda i: (0, 0)),
        ],
        out_specs=pl.BlockSpec((TBg, lanes_in), lambda i: (i, 0)),
        compiler_params=pltpu.CompilerParams(
            dimension_semantics=("parallel",),
            vmem_limit_bytes=vmem_limit_bytes,
        ),
        cost_estimate=cost,
    )(x_packed, w_enc_bd, b_enc_t, w_dec_bd, b_dec_t)

    # Undo the packing (free reshape), drop the tiny pad, then unsqueeze(2).
    out2d = out_packed.reshape(B_pad, motion_dim)
    if B_pad != B:
        out2d = out2d[:B]
    return jnp.expand_dims(out2d, 2)                  # (B, motion_dim, 1)


def _ref_forward(x, w_enc, b_enc, w_dec, b_dec):
    """Pure-JAX reference mirroring the PyTorch module exactly."""
    x2d = jnp.squeeze(x, axis=2)
    h = jnp.tanh(x2d @ w_enc.T + b_enc)
    y = h @ w_dec.T + b_dec
    return jnp.expand_dims(y, 2)


if __name__ == "__main__":
    motion_dim, latent_dim = 32, 16

    key = jax.random.PRNGKey(0)
    k_x, k_we, k_be, k_wd, k_bd, k_x2, k_x3 = jax.random.split(key, 7)

    # Deterministic synthetic parameters (PyTorch Linear layout: (out, in)).
    w_enc = jax.random.normal(k_we, (latent_dim, motion_dim), jnp.float32) * 0.1
    b_enc = jax.random.normal(k_be, (latent_dim,), jnp.float32) * 0.1
    w_dec = jax.random.normal(k_wd, (motion_dim, latent_dim), jnp.float32) * 0.1
    b_dec = jax.random.normal(k_bd, (motion_dim,), jnp.float32) * 0.1

    fwd = jax.jit(dae_forward, static_argnames=("tbg_cap", "vmem_limit_bytes"))

    # Case 1: small batch (single tile, padded only to pack*8 rows).
    B = 8
    x = jax.random.normal(k_x, (B, motion_dim, 1), jnp.float32)
    out = jax.block_until_ready(fwd(x, w_enc, b_enc, w_dec, b_dec))
    ref = _ref_forward(x, w_enc, b_enc, w_dec, b_dec)
    assert out.shape == (B, motion_dim, 1), out.shape
    assert jnp.allclose(out, ref, atol=1e-5, rtol=1e-5), "mismatch vs reference (B=8)"

    # Case 2: non-multiple-of-32 batch (exercises the tiny pad path).
    B2 = 300
    x2 = jax.random.normal(k_x2, (B2, motion_dim, 1), jnp.float32)
    out2 = jax.block_until_ready(fwd(x2, w_enc, b_enc, w_dec, b_dec))
    ref2 = _ref_forward(x2, w_enc, b_enc, w_dec, b_dec)
    assert out2.shape == (B2, motion_dim, 1), out2.shape
    assert jnp.allclose(out2, ref2, atol=1e-5, rtol=1e-5), "mismatch vs reference (B=300)"

    # Case 3: small tile cap to exercise a multi-step grid with a partial
    # (masked) final block, as used for very large batches.
    B3 = 280
    x3 = jax.random.normal(k_x3, (B3, motion_dim, 1), jnp.float32)
    out3 = jax.block_until_ready(fwd(x3, w_enc, b_enc, w_dec, b_dec, tbg_cap=16))
    ref3 = _ref_forward(x3, w_enc, b_enc, w_dec, b_dec)
    assert out3.shape == (B3, motion_dim, 1), out3.shape
    assert jnp.allclose(out3, ref3, atol=1e-5, rtol=1e-5), "mismatch vs reference (B=280)"

    print("KERNEL_OK")
</pallas_src>

<mosaic_0001>
module attributes {stable_mosaic.version = 11 : i64} {
  func.func @dae_kernel(%arg0: i32, %arg1: memref<8x128xf32, #tpu.memory_space<vmem>>, %arg2: memref<128x64xf32, #tpu.memory_space<vmem>>, %arg3: memref<1x64xf32, #tpu.memory_space<vmem>>, %arg4: memref<64x128xf32, #tpu.memory_space<vmem>>, %arg5: memref<1x128xf32, #tpu.memory_space<vmem>>, %arg6: memref<8x128xf32, #tpu.memory_space<vmem>>) attributes {dimension_semantics = [#tpu.dimension_semantics<parallel>], iteration_bounds = array<i64: 1>, scalar_prefetch = 0 : i64, scratch_operands = 0 : i64, tpu.core_type = #tpu.core_type<tc>, window_params = [{transform_indices = @transform_0, window_bounds = array<i64: 8, 128>}, {pipeline_mode = #tpu.pipeline_mode<synchronous>, transform_indices = @transform_1, window_bounds = array<i64: 128, 64>}, {pipeline_mode = #tpu.pipeline_mode<synchronous>, transform_indices = @transform_2, window_bounds = array<i64: 1, 64>}, {pipeline_mode = #tpu.pipeline_mode<synchronous>, transform_indices = @transform_3, window_bounds = array<i64: 64, 128>}, {pipeline_mode = #tpu.pipeline_mode<synchronous>, transform_indices = @transform_4, window_bounds = array<i64: 1, 128>}, {transform_indices = @transform_5, window_bounds = array<i64: 8, 128>}]} {
    %c0 = arith.constant 0 : index
    %c0_0 = arith.constant 0 : index
    %0 = vector.load %arg1[%c0, %c0_0] : memref<8x128xf32, #tpu.memory_space<vmem>>, vector<8x128xf32>
    %c0_1 = arith.constant 0 : index
    %c0_2 = arith.constant 0 : index
    %1 = vector.load %arg2[%c0_1, %c0_2] : memref<128x64xf32, #tpu.memory_space<vmem>>, vector<128x64xf32>
    %cst = arith.constant dense<0.000000e+00> : vector<8x64xf32>
    %2 = tpu.matmul %0, %1, %cst {dimension_numbers = #tpu.dot_dimension_numbers<[1], [0], [0], [1], [0, 0, 1, 1], [], []>} : vector<8x128xf32>, vector<128x64xf32>, vector<8x64xf32> -> vector<8x64xf32>
    %c0_3 = arith.constant 0 : index
    %c0_4 = arith.constant 0 : index
    %3 = vector.load %arg3[%c0_3, %c0_4] : memref<1x64xf32, #tpu.memory_space<vmem>>, vector<1x64xf32>
    %4 = vector.broadcast %3 : vector<1x64xf32> to vector<8x64xf32>
    %5 = arith.addf %2, %4 : vector<8x64xf32>
    %6 = math.tanh %5 : vector<8x64xf32>
    %c0_5 = arith.constant 0 : index
    %c0_6 = arith.constant 0 : index
    %7 = vector.load %arg4[%c0_5, %c0_6] : memref<64x128xf32, #tpu.memory_space<vmem>>, vector<64x128xf32>
    %cst_7 = arith.constant dense<0.000000e+00> : vector<8x128xf32>
    %8 = tpu.matmul %6, %7, %cst_7 {dimension_numbers = #tpu.dot_dimension_numbers<[1], [0], [0], [1], [0, 0, 1, 1], [], []>} : vector<8x64xf32>, vector<64x128xf32>, vector<8x128xf32> -> vector<8x128xf32>
    %c0_8 = arith.constant 0 : index
    %c0_9 = arith.constant 0 : index
    %9 = vector.load %arg5[%c0_8, %c0_9] : memref<1x128xf32, #tpu.memory_space<vmem>>, vector<1x128xf32>
    %10 = vector.broadcast %9 : vector<1x128xf32> to vector<8x128xf32>
    %11 = arith.addf %8, %10 : vector<8x128xf32>
    %c0_10 = arith.constant 0 : index
    %c0_11 = arith.constant 0 : index
    %12 = vector.load %arg6[%c0_10, %c0_11] : memref<8x128xf32, #tpu.memory_space<vmem>>, vector<8x128xf32>
    tpu.vector_store %arg6[%c0_10, %c0_11], %11 {strides = array<i32>} : memref<8x128xf32, #tpu.memory_space<vmem>>, vector<8x128xf32>,
    return
  }
  func.func @transform_0(%arg0: i32) -> (i32, i32) {
    %c0_i32 = arith.constant 0 : i32
    %c0_i32_0 = arith.constant 0 : i32
    return %arg0, %c0_i32 : i32, i32
  }
  func.func @transform_1(%arg0: i32) -> (i32, i32) {
    %c0_i32 = arith.constant 0 : i32
    %c0_i32_0 = arith.constant 0 : i32
    %c0_i32_1 = arith.constant 0 : i32
    return %c0_i32, %c0_i32_0 : i32, i32
  }
  func.func @transform_2(%arg0: i32) -> (i32, i32) {
    %c0_i32 = arith.constant 0 : i32
    %c0_i32_0 = arith.constant 0 : i32
    %c0_i32_1 = arith.constant 0 : i32
    return %c0_i32, %c0_i32_0 : i32, i32
  }
  func.func @transform_3(%arg0: i32) -> (i32, i32) {
    %c0_i32 = arith.constant 0 : i32
    %c0_i32_0 = arith.constant 0 : i32
    %c0_i32_1 = arith.constant 0 : i32
    return %c0_i32, %c0_i32_0 : i32, i32
  }
  func.func @transform_4(%arg0: i32) -> (i32, i32) {
    %c0_i32 = arith.constant 0 : i32
    %c0_i32_0 = arith.constant 0 : i32
    %c0_i32_1 = arith.constant 0 : i32
    return %c0_i32, %c0_i32_0 : i32, i32
  }
  func.func @transform_5(%arg0: i32) -> (i32, i32) {
    %c0_i32 = arith.constant 0 : i32
    %c0_i32_0 = arith.constant 0 : i32
    return %arg0, %c0_i32 : i32, i32
  }
}

</mosaic_0001>

<bundles_post_ra>
// kernel: tile.13
= control target key start
LH: loop header
LB: loop body
LE: loop exit
PB: predicated region body
PF: predicated region fallthrough
CT: control target
= control target key end

     0   :  { %s22_s0 = inlined_call_operand.vmem [shape: f32[16], index: 0, kind: input, shape index: {}]   ;;  %s23_s1 = inlined_call_operand.vmem [shape: f32[4,16], index: 1, kind: output, shape index: {}]  }
   0x1   :  { %v4_v0 = vld [vmem:[%s22_s0] ss:$0 sm:$0xff] }
   0x2   :  { %5 = vst [vmem:[%s23_s1] sm:$0xf] %v4_v0 }

// kernel: tile.14
= control target key start
LH: loop header
LB: loop body
LE: loop exit
PB: predicated region body
PF: predicated region fallthrough
CT: control target
= control target key end

     0   :  { %vm7_vm0 = vcmask 130048   ;;  %s37_s8 = smov 16   ;;  %s38_s9 = smov 32   ;;  %vm13_vm1 = vcmask 523648   ;;  %vm19_vm2 = vcmask 392448   ;;  %vm25_vm3 = vcmask 261248   ;;  %s55_s0 = inlined_call_operand.vmem [shape: f32[4,16], index: 0, kind: input, shape index: {}]   ;;  %s56_s1 = inlined_call_operand.vmem [shape: f32[1,64], index: 1, kind: output, shape index: {}]  }
   0x1   :  { %v4_v0 = vld [vmem:[%s55_s0] sm:$0xf]  ;;  %s36_s0 = smov 48  }
   0x2   :  { %5 = vst [vmem:[#allocation1] sm:$0xf] %v4_v0 }
   0x9   :  { %v10_v1 = vld [vmem:[#allocation1 + $0x3] sm:$0x1]   ;;  %v22_v2 = vld [vmem:[#allocation1 + $0x1] sm:$0x1]   ;;  %v6_v3 = vld [vmem:[#allocation1] sm:$0x1]  }
   0xa   :  { %11 = vrot.lane.b32.xlu0 %v10_v1, %s36_s0  ;;  %23 = vrot.lane.b32.xlu1 %v22_v2, %s37_s8  ;;  %v16_v4 = vld [vmem:[#allocation1 + $0x2] sm:$0x1]   ;;  %8 = vst.msk [vmem:[#allocation0] sm:$0x1] %vm7_vm0, %v6_v3  }
   0xe   :  { %17 = vrot.lane.b32.xlu0 %v16_v4, %s38_s9 }
  0x7c   :  { %v12_v5 = vpop.permute.xlu0 %11   ;;  %v24_v6 = vpop.permute.xlu1 %23  }
  0x7d   :  { %14 = vst.msk [vmem:[#allocation0] sm:$0x1] %vm13_vm1, %v12_v5  }
  0x80   :  { %v18_v7 = vpop.permute.xlu0 %17  }
  0x81   :  { %20 = vst.msk [vmem:[#allocation0] sm:$0x1] %vm19_vm2, %v18_v7  }
  0x82   :  { %26 = vst.msk [vmem:[#allocation0] sm:$0x1] %vm25_vm3, %v24_v6  }
  0x89   :  { %v30_v8 = vld [vmem:[#allocation0] sm:$0x1] }
  0x8a   :  { %32 = vst [vmem:[%s56_s1] sm:$0x1] %v30_v8 }

// kernel: tile.18
= control target key start
LH: loop header
LB: loop body
LE: loop exit
PB: predicated region body
PF: predicated region fallthrough
CT: control target
= control target key end

     0   :  { %s22_s0 = inlined_call_operand.vmem [shape: f32[32], index: 0, kind: input, shape index: {}]   ;;  %s23_s1 = inlined_call_operand.vmem [shape: f32[4,32], index: 1, kind: output, shape index: {}]  }
   0x1   :  { %v4_v0 = vld [vmem:[%s22_s0] ss:$0 sm:$0xff] }
   0x2   :  { %5 = vst [vmem:[%s23_s1] sm:$0xf] %v4_v0 }

// kernel: tile.19
= control target key start
LH: loop header
LB: loop body
LE: loop exit
PB: predicated region body
PF: predicated region fallthrough
CT: control target
= control target key end

     0   :  { %vm7_vm0 = vcmask 261120   ;;  %s37_s8 = smov 32   ;;  %s38_s9 = smov 64   ;;  %vm13_vm1 = vcmask 1048320   ;;  %vm19_vm2 = vcmask 785920   ;;  %vm25_vm3 = vcmask 523520   ;;  %s55_s0 = inlined_call_operand.vmem [shape: f32[4,32], index: 0, kind: input, shape index: {}]   ;;  %s56_s1 = inlined_call_operand.vmem [shape: f32[1,128], index: 1, kind: output, shape index: {}]  }
   0x1   :  { %v4_v0 = vld [vmem:[%s55_s0] sm:$0xf]  ;;  %s36_s0 = smov 96  }
   0x2   :  { %5 = vst [vmem:[#allocation1] sm:$0xf] %v4_v0 }
   0x9   :  { %v10_v1 = vld [vmem:[#allocation1 + $0x3] sm:$0x1]   ;;  %v22_v2 = vld [vmem:[#allocation1 + $0x1] sm:$0x1]   ;;  %v6_v3 = vld [vmem:[#allocation1] sm:$0x1]  }
   0xa   :  { %11 = vrot.lane.b32.xlu0 %v10_v1, %s36_s0  ;;  %23 = vrot.lane.b32.xlu1 %v22_v2, %s37_s8  ;;  %v16_v4 = vld [vmem:[#allocation1 + $0x2] sm:$0x1]   ;;  %8 = vst.msk [vmem:[#allocation0] sm:$0x1] %vm7_vm0, %v6_v3  }
   0xe   :  { %17 = vrot.lane.b32.xlu0 %v16_v4, %s38_s9 }
  0x7c   :  { %v12_v5 = vpop.permute.xlu0 %11   ;;  %v24_v6 = vpop.permute.xlu1 %23  }
  0x7d   :  { %14 = vst.msk [vmem:[#allocation0] sm:$0x1] %vm13_vm1, %v12_v5  }
  0x80   :  { %v18_v7 = vpop.permute.xlu0 %17  }
  0x81   :  { %20 = vst.msk [vmem:[#allocation0] sm:$0x1] %vm19_vm2, %v18_v7  }
  0x82   :  { %26 = vst.msk [vmem:[#allocation0] sm:$0x1] %vm25_vm3, %v24_v6  }
  0x89   :  { %v30_v8 = vld [vmem:[#allocation0] sm:$0x1] }
  0x8a   :  { %32 = vst [vmem:[%s56_s1] sm:$0x1] %v30_v8 }

// kernel: dae_forward.1
= control target key start
LH: loop header
LB: loop body
LE: loop exit
PB: predicated region body
PF: predicated region fallthrough
CT: control target
= control target key end

     0   :  { %v333_v0 = vmov 0.0|0.0   ;;  %vm334_vm0 = vmmov 0   ;;  %v335_v4 = vmov 0.0   ;;  %vm130_vm1 = vcmask 523264   ;;  %s462_s1 = inlined_call_operand.vmem [shape: f32[128,64], index: 1, kind: input, shape index: {}]   ;;  %s463_s3 = inlined_call_operand.vmem [shape: f32[64,128], index: 3, kind: input, shape index: {}]   ;;  %s464_s0 = inlined_call_operand.vmem [shape: f32[8,128], index: 0, kind: input, shape index: {}]   ;;  %s465_s2 = inlined_call_operand.vmem [shape: f32[1,64], index: 2, kind: input, shape index: {}]   ;;  %s466_s4 = inlined_call_operand.vmem [shape: f32[1,128], index: 4, kind: input, shape index: {}]   ;;  %s467_s5 = inlined_call_operand.vmem [shape: f32[8,128], index: 5, kind: output, shape index: {}]  }
   0x1   :  { %292 = vmatprep.subr.bf16.mxu0 %v333_v0  ;;  %v21_v1 = vld [vmem:[%s462_s1] sm:$0xff]  ;;  %v22_v2 = vld [vmem:[%s462_s1 + $0x8] sm:$0xff]  ;;  %v23_v3 = vld [vmem:[%s462_s1 + $0x10] sm:$0xff]  ;;  %270 = vmatprep.mubr.msk.f32.mxu0 %vm334_vm0, %v335_v4 }
   0x2   :  { %v293_v5 = vpack.c.bf16 %v22_v2, %v21_v1  ;;  %v24_v6 = vld [vmem:[%s462_s1 + $0x18] sm:$0xff]  ;;  %316 = vmatprep.subr.bf16.mxu1 %v333_v0  ;;  %289 = vmatprep.mubr.msk.f32.mxu1 %vm334_vm0, %v335_v4  ;;  %v25_v8 = vld [vmem:[%s462_s1 + $0x20] sm:$0xff]  ;;  %v26_v9 = vld [vmem:[%s462_s1 + $0x28] sm:$0xff] }
   0x3   :  { %v296_v7 = vpack.c.bf16 %v24_v6, %v23_v3  ;;  %v115_v10 = vld [vmem:[%s463_s3] sm:$0xff]  ;;  %v116_v11 = vld [vmem:[%s463_s3 + $0x8] sm:$0xff]  ;;  %v299_v12 = vpack.c.bf16 %v26_v9, %v25_v8  ;;  %v27_v14 = vld [vmem:[%s462_s1 + $0x30] sm:$0xff] }
   0x4   :  { %294 = vmatpush3.bf16.msra.mxu0 %v293_v5  ;;  %v317_v13 = vpack.c.bf16 %v116_v11, %v115_v10  ;;  %v28_v15 = vld [vmem:[%s462_s1 + $0x38] sm:$0xff]  ;;  %v29_v17 = vld [vmem:[%s462_s1 + $0x40] sm:$0xff]  ;;  %v30_v18 = vld [vmem:[%s462_s1 + $0x48] sm:$0xff] }
   0x5   :  { %295 = vmatprep.subr.bf16.mxu0 %v333_v0  ;;  %v302_v16 = vpack.c.bf16 %v28_v15, %v27_v14  ;;  %v305_v19 = vpack.c.bf16 %v30_v18, %v29_v17  ;;  %v31_v20 = vld [vmem:[%s462_s1 + $0x50] sm:$0xff]  ;;  %v32_v21 = vld [vmem:[%s462_s1 + $0x58] sm:$0xff]  ;;  %v33_v23 = vld [vmem:[%s462_s1 + $0x60] sm:$0xff] }
   0x6   :  { %318 = vmatpush3.bf16.msra.mxu1 %v317_v13  ;;  %v308_v22 = vpack.c.bf16 %v32_v21, %v31_v20  ;;  %v34_v24 = vld [vmem:[%s462_s1 + $0x68] sm:$0xff]  ;;  %v35_v26 = vld [vmem:[%s462_s1 + $0x70] sm:$0xff]  ;;  %v36_v27 = vld [vmem:[%s462_s1 + $0x78] sm:$0xff] }
   0x7   :  { %319 = vmatprep.subr.bf16.mxu1 %v333_v0  ;;  %v311_v25 = vpack.c.bf16 %v34_v24, %v33_v23  ;;  %v314_v28 = vpack.c.bf16 %v36_v27, %v35_v26  ;;  %v20_v29 = vld [vmem:[%s464_s0] sm:$0xff]  ;;  %v117_v30 = vld [vmem:[%s463_s3 + $0x10] sm:$0xff]  ;;  %v118_v31 = vld [vmem:[%s463_s3 + $0x18] sm:$0xff] }
   0x8   :  { %297 = vmatpush3.bf16.msra.mxu0 %v296_v7  ;;  %v320_v32 = vpack.c.bf16 %v118_v31, %v117_v30  ;;  %v119_v33 = vld [vmem:[%s463_s3 + $0x20] sm:$0xff]  ;;  %v120_v34 = vld [vmem:[%s463_s3 + $0x28] sm:$0xff]  ;;  %v121_v36 = vld [vmem:[%s463_s3 + $0x30] sm:$0xff] }
   0x9   :  { %298 = vmatprep.subr.bf16.mxu0 %v333_v0  ;;  %v323_v35 = vpack.c.bf16 %v120_v34, %v119_v33  ;;  %v122_v37 = vld [vmem:[%s463_s3 + $0x38] sm:$0xff]  ;;  %v209_v39 = vld [vmem:[%s465_s2] ss:$0 sm:$0xff] }
   0xa   :  { %321 = vmatpush3.bf16.msra.mxu1 %v320_v32  ;;  %v326_v38 = vpack.c.bf16 %v122_v37, %v121_v36  ;;  %v210_v44 = vld [vmem:[%s466_s4] ss:$0 sm:$0xff] }
   0xb   :  { %322 = vmatprep.subr.bf16.mxu1 %v333_v0 }
   0xc   :  { %300 = vmatpush3.bf16.msra.mxu0 %v299_v12 }
   0xd   :  { %301 = vmatprep.subr.bf16.mxu0 %v333_v0 }
   0xe   :  { %324 = vmatpush3.bf16.msra.mxu1 %v323_v35 }
   0xf   :  { %325 = vmatprep.subr.bf16.mxu1 %v333_v0 }
  0x10   :  { %303 = vmatpush3.bf16.msra.mxu0 %v302_v16 }
  0x11   :  { %304 = vmatprep.subr.bf16.mxu0 %v333_v0 }
  0x12   :  { %327 = vmatpush3.bf16.msra.mxu1 %v326_v38 }
  0x14   :  { %306 = vmatpush3.bf16.msra.mxu0 %v305_v19 }
  0x15   :  { %307 = vmatprep.subr.bf16.mxu0 %v333_v0 }
  0x18   :  { %309 = vmatpush3.bf16.msra.mxu0 %v308_v22 }
  0x19   :  { %310 = vmatprep.subr.bf16.mxu0 %v333_v0 }
  0x1c   :  { %312 = vmatpush3.bf16.msra.mxu0 %v311_v25 }
  0x1d   :  { %313 = vmatprep.subr.bf16.mxu0 %v333_v0 }
  0x20   :  { %315 = vmatpush3.bf16.msra.mxu0 %v314_v28 }
  0x23   :  { %271 = vmatmul.mubr.f32.vlgmr.msra.gmra.mrb[0].mxu0 %v20_v29 }
  0xf6   :  { %v110_v40 = vpop.f32.mrb[0].mxu0 }
  0xf7   :  { %v111_v41 = vadd.f32 %v209_v39, %v110_v40  ;;  %v272_v42 = vpop.f32.mrb[1].mxu0 }
  0xf9   :  { %331 = vtanh.f32 %v111_v41 }
 0x103   :  { %v332_v43 = vpop.eup %331 }
 0x104   :  { %290 = vmatmul.mubr.msk.f32.vlgmr.msra.gmra.mrb[0].mxu1 %vm130_vm1, %v332_v43 }
 0x1d7   :  { %v200_v45 = vpop.f32.mrb[0].mxu1 }
 0x1d8   :  { %v201_v46 = vadd.f32 %v210_v44, %v200_v45  ;;  %v291_v47 = vpop.f32.mrb[1].mxu1 }
 0x1da   :  { %204 = vst [vmem:[%s467_s5] sm:$0xff] %v201_v46 }

</bundles_post_ra>
